<compile_context>
chip_gen: v6e
topology: v6e:2x2x1
jax: 0.10.0
libtpu: 0.0.40
codegen_flags: <defaults>
</compile_context>

<pallas_src>
import jax
import jax.numpy as jnp
from jax.experimental import pallas as pl
from jax.experimental.pallas import tpu as pltpu

FLOAT_MIN = float(jnp.finfo(jnp.float32).min)


# ----------------------------- kernels ---------------------------------------------------------


def _mlp_logits(x_ref, w1_ref, b1_ref, w2_ref, b2_ref, w3_ref, b3_ref):
    """Shared MLP body on packed rows: 2 hidden tanh layers + linear logits head.

    x_ref is bf16 [TB, p*D]; weights are bf16 block-diagonal; accumulation, bias adds and
    tanh are f32.  Bias refs are (1, width) and broadcast in-kernel (cheap sublane bcast).
    """
    x = x_ref[...]                                                       # bf16 [TB, p*D]
    h1 = jnp.tanh(jnp.dot(x, w1_ref[...],
                          preferred_element_type=jnp.float32) + b1_ref[...])
    h2 = jnp.tanh(jnp.dot(h1.astype(jnp.bfloat16), w2_ref[...],
                          preferred_element_type=jnp.float32) + b2_ref[...])
    logits = jnp.dot(h2.astype(jnp.bfloat16), w3_ref[...],
                     preferred_element_type=jnp.float32) + b3_ref[...]
    return logits                                                        # f32 [TB, p*A]


def _masked_kernel(x_ref, mask_ref, w1_ref, b1_ref, w2_ref, b2_ref, w3_ref, b3_ref, out_ref):
    logits = _mlp_logits(x_ref, w1_ref, b1_ref, w2_ref, b2_ref, w3_ref, b3_ref)
    out_ref[...] = jnp.where(mask_ref[...] != 0, logits, jnp.float32(FLOAT_MIN))


def _nomask_kernel(x_ref, w1_ref, b1_ref, w2_ref, b2_ref, w3_ref, b3_ref, out_ref):
    out_ref[...] = _mlp_logits(x_ref, w1_ref, b1_ref, w2_ref, b2_ref, w3_ref, b3_ref)


# ----------------------------- host-side wrapper ------------------------------------------------


def _round_up(x, m):
    return ((x + m - 1) // m) * m


def _block_diag(w, p):
    """p copies of w on the diagonal: (din, dout) -> (p*din, p*dout). Exact (only 0/1 scales)."""
    if p == 1:
        return w
    return jnp.kron(jnp.eye(p, dtype=w.dtype), w)


def fc_masked_actions_forward(real_obs, action_mask, params, *, no_masking=False, tile_b=8192):
    """Pallas-backed forward pass of FCMaskedActionsModelTorch (returns [B, A] masked logits)."""
    B, D = real_obs.shape
    H1 = params["w1"].shape[1]
    H2 = params["w2"].shape[1]
    A = params["w3"].shape[1]

    # --- row packing factor: put p batch rows side-by-side in the 128-lane dimension --------
    widest = max(D, H1, H2, A)
    p = max(1, 128 // widest)

    B_pad = _round_up(B, p)
    pad = B_pad - B

    # bf16 obs on the host: numerically what the kernel used anyway, half the input DMA bytes.
    x = real_obs.astype(jnp.bfloat16)
    if pad:
        x = jnp.pad(x, ((0, pad), (0, 0)))
    n_rows = B_pad // p                      # packed rows
    xp = x.reshape(n_rows, p * D)            # rows are contiguous -> free relayout

    # Block-diagonal bf16 weights (native MXU operands) + lane-tiled f32 biases.
    w1 = _block_diag(params["w1"].astype(jnp.bfloat16), p)          # (p*D,  p*H1)
    w2 = _block_diag(params["w2"].astype(jnp.bfloat16), p)          # (p*H1, p*H2)
    w3 = _block_diag(params["w3"].astype(jnp.bfloat16), p)          # (p*H2, p*A)
    b1 = jnp.tile(params["b1"].reshape(1, H1).astype(jnp.float32), (1, p))   # (1, p*H1)
    b2 = jnp.tile(params["b2"].reshape(1, H2).astype(jnp.float32), (1, p))   # (1, p*H2)
    b3 = jnp.tile(params["b3"].reshape(1, A).astype(jnp.float32), (1, p))    # (1, p*A)

    # --- batch tile (in packed rows) ---------------------------------------------------------
    tile_p = max(32, tile_b // p)            # multiple of 32 keeps every tiled block legal
    if n_rows > tile_p:
        tb = tile_p
    elif n_rows >= 64:
        # >= 2 parallel grid steps even for mid-size batches: enables DMA/compute overlap and
        # megacore sharding across v7x's 2 TensorCores (harmless on 1-TC v5e/v6e).
        tb = _round_up(pl.cdiv(n_rows, 2), 32)
    else:
        tb = n_rows                          # full-extent block: always layout-legal
    grid = (pl.cdiv(n_rows, tb),)

    def row_spec(cols):                      # batch-tiled operand
        return pl.BlockSpec((tb, cols), lambda i: (i, 0))

    def const_spec(arr):                     # grid-invariant operand: DMA'd once, VMEM-resident
        return pl.BlockSpec(arr.shape, lambda i: (0, 0))

    weight_args = (w1, b1, w2, b2, w3, b3)
    weight_specs = [const_spec(a) for a in weight_args]
    out_spec = pl.BlockSpec((tb, p * A), lambda i: (i, 0))
    out_shape = jax.ShapeDtypeStruct((n_rows, p * A), jnp.float32)
    cparams = pltpu.CompilerParams(dimension_semantics=("parallel",))

    if no_masking:
        # Maskless variant: no all-ones mask is materialized, written to HBM, or DMA'd.
        packed = pl.pallas_call(
            _nomask_kernel,
            out_shape=out_shape,
            grid=grid,
            in_specs=[row_spec(p * D)] + weight_specs,
            out_specs=out_spec,
            compiler_params=cparams,
        )(xp, *weight_args)
    else:
        # Faithful to the torch `action_mask == 1`; int8 thereafter (4x fewer mask DMA bytes).
        mask = (action_mask == 1).astype(jnp.int8)
        if pad:
            mask = jnp.pad(mask, ((0, pad), (0, 0)))
        maskp = mask.reshape(n_rows, p * A)
        packed = pl.pallas_call(
            _masked_kernel,
            out_shape=out_shape,
            grid=grid,
            in_specs=[row_spec(p * D), row_spec(p * A)] + weight_specs,
            out_specs=out_spec,
            compiler_params=cparams,
        )(xp, maskp, *weight_args)

    return packed.reshape(B_pad, A)[:B]      # unpack rows (free) and drop batch padding


# ----------------------------- reference & init -------------------------------------------------


def init_params(key, obs_dim, hidden, n_actions):
    """Deterministic synthetic init for the TorchFC 'action_embed_model' logits branch."""
    ks = jax.random.split(key, 6)
    scale = lambda fan_in: 1.0 / jnp.sqrt(jnp.float32(fan_in))
    return {
        "w1": jax.random.normal(ks[0], (obs_dim, hidden), jnp.float32) * scale(obs_dim),
        "b1": jax.random.normal(ks[1], (1, hidden), jnp.float32) * 0.01,
        "w2": jax.random.normal(ks[2], (hidden, hidden), jnp.float32) * scale(hidden),
        "b2": jax.random.normal(ks[3], (1, hidden), jnp.float32) * 0.01,
        "w3": jax.random.normal(ks[4], (hidden, n_actions), jnp.float32) * scale(hidden),
        "b3": jax.random.normal(ks[5], (1, n_actions), jnp.float32) * 0.01,
    }


def reference_forward(real_obs, action_mask, params, *, no_masking=False):
    """Pure-JAX reference mirroring the kernel's bf16-operand / f32-accumulate numerics."""
    w1 = params["w1"].astype(jnp.bfloat16)
    w2 = params["w2"].astype(jnp.bfloat16)
    w3 = params["w3"].astype(jnp.bfloat16)
    h1 = jnp.tanh(jnp.dot(real_obs.astype(jnp.bfloat16), w1,
                          preferred_element_type=jnp.float32) + params["b1"])
    h2 = jnp.tanh(jnp.dot(h1.astype(jnp.bfloat16), w2,
                          preferred_element_type=jnp.float32) + params["b2"])
    logits = jnp.dot(h2.astype(jnp.bfloat16), w3,
                     preferred_element_type=jnp.float32) + params["b3"]
    if no_masking:
        return logits
    return jnp.where(action_mask == 1, logits, jnp.float32(FLOAT_MIN))


# ----------------------------- demo -------------------------------------------------------------

if __name__ == "__main__":
    N_ACTIONS = 8    # action_space.n
    OBS_DIM = 32     # obs_space.shape[0] - action_space.n  (the MultiBinary "real_obs" part)
    HIDDEN = 32      # fcnet_hiddens = [32, 32]

    key = jax.random.PRNGKey(0)
    k_obs, k_mask, k_obs2, k_mask2 = jax.random.split(key, 4)
    params = init_params(jax.random.PRNGKey(42), OBS_DIM, HIDDEN, N_ACTIONS)

    # Main case: B=256 -> pack factor 4 -> 64 packed rows; tile_b=128 -> 2 parallel grid steps.
    B = 256
    real_obs = jax.random.bernoulli(k_obs, 0.5, (B, OBS_DIM)).astype(jnp.float32)
    action_mask = jax.random.bernoulli(k_mask, 0.6, (B, N_ACTIONS)).astype(jnp.int32)

    out = jax.block_until_ready(
        fc_masked_actions_forward(real_obs, action_mask, params, tile_b=128))
    ref = reference_forward(real_obs, action_mask, params)
    assert out.shape == (B, N_ACTIONS)
    assert jnp.allclose(out, ref, atol=1e-3, rtol=1e-3), "masked path mismatch vs reference"
    assert bool(jnp.all(jnp.where(action_mask == 0, out == jnp.float32(FLOAT_MIN), True))), \
        "masked entries must be exactly FLOAT_MIN"

    # no_masking path (separate maskless kernel, no all-ones mask DMA).
    out_nm = jax.block_until_ready(
        fc_masked_actions_forward(real_obs, action_mask, params, no_masking=True, tile_b=128))
    ref_nm = reference_forward(real_obs, action_mask, params, no_masking=True)
    assert jnp.allclose(out_nm, ref_nm, atol=1e-3, rtol=1e-3), "no-masking path mismatch"

    # Ragged batch (B not a multiple of the pack factor): exercises pad + slice path.
    B2 = 50
    real_obs2 = jax.random.bernoulli(k_obs2, 0.5, (B2, OBS_DIM)).astype(jnp.float32)
    action_mask2 = jax.random.bernoulli(k_mask2, 0.6, (B2, N_ACTIONS)).astype(jnp.int32)
    out2 = jax.block_until_ready(fc_masked_actions_forward(real_obs2, action_mask2, params))
    ref2 = reference_forward(real_obs2, action_mask2, params)
    assert out2.shape == (B2, N_ACTIONS)
    assert jnp.allclose(out2, ref2, atol=1e-3, rtol=1e-3), "ragged-batch path mismatch"

    print("KERNEL_OK")
</pallas_src>

<mosaic_0001>
module attributes {stable_mosaic.version = 11 : i64} {
  func.func @_masked_kernel(%arg0: i32, %arg1: memref<32x128xbf16, #tpu.memory_space<vmem>>, %arg2: memref<32x32xi8, #tpu.memory_space<vmem>>, %arg3: memref<128x128xbf16, #tpu.memory_space<vmem>>, %arg4: memref<1x128xf32, #tpu.memory_space<vmem>>, %arg5: memref<128x128xbf16, #tpu.memory_space<vmem>>, %arg6: memref<1x128xf32, #tpu.memory_space<vmem>>, %arg7: memref<128x32xbf16, #tpu.memory_space<vmem>>, %arg8: memref<1x32xf32, #tpu.memory_space<vmem>>, %arg9: memref<32x32xf32, #tpu.memory_space<vmem>>) attributes {dimension_semantics = [#tpu.dimension_semantics<parallel>], iteration_bounds = array<i64: 2>, scalar_prefetch = 0 : i64, scratch_operands = 0 : i64, tpu.core_type = #tpu.core_type<tc>, window_params = [{transform_indices = @transform_0, window_bounds = array<i64: 32, 128>}, {transform_indices = @transform_1, window_bounds = array<i64: 32, 32>}, {pipeline_mode = #tpu.pipeline_mode<synchronous>, transform_indices = @transform_2, window_bounds = array<i64: 128, 128>}, {pipeline_mode = #tpu.pipeline_mode<synchronous>, transform_indices = @transform_3, window_bounds = array<i64: 1, 128>}, {pipeline_mode = #tpu.pipeline_mode<synchronous>, transform_indices = @transform_4, window_bounds = array<i64: 128, 128>}, {pipeline_mode = #tpu.pipeline_mode<synchronous>, transform_indices = @transform_5, window_bounds = array<i64: 1, 128>}, {pipeline_mode = #tpu.pipeline_mode<synchronous>, transform_indices = @transform_6, window_bounds = array<i64: 128, 32>}, {pipeline_mode = #tpu.pipeline_mode<synchronous>, transform_indices = @transform_7, window_bounds = array<i64: 1, 32>}, {transform_indices = @transform_8, window_bounds = array<i64: 32, 32>}]} {
    %c0 = arith.constant 0 : index
    %c0_0 = arith.constant 0 : index
    %0 = vector.load %arg1[%c0, %c0_0] : memref<32x128xbf16, #tpu.memory_space<vmem>>, vector<32x128xbf16>
    %c0_1 = arith.constant 0 : index
    %c0_2 = arith.constant 0 : index
    %1 = vector.load %arg3[%c0_1, %c0_2] : memref<128x128xbf16, #tpu.memory_space<vmem>>, vector<128x128xbf16>
    %cst = arith.constant dense<0.000000e+00> : vector<32x128xf32>
    %2 = tpu.matmul %0, %1, %cst {dimension_numbers = #tpu.dot_dimension_numbers<[1], [0], [0], [1], [0, 0, 1, 1], [], []>} : vector<32x128xbf16>, vector<128x128xbf16>, vector<32x128xf32> -> vector<32x128xf32>
    %c0_3 = arith.constant 0 : index
    %c0_4 = arith.constant 0 : index
    %3 = vector.load %arg4[%c0_3, %c0_4] : memref<1x128xf32, #tpu.memory_space<vmem>>, vector<1x128xf32>
    %4 = vector.broadcast %3 : vector<1x128xf32> to vector<32x128xf32>
    %5 = arith.addf %2, %4 : vector<32x128xf32>
    %6 = math.tanh %5 : vector<32x128xf32>
    %7 = arith.truncf %6 : vector<32x128xf32> to vector<32x128xbf16>
    %c0_5 = arith.constant 0 : index
    %c0_6 = arith.constant 0 : index
    %8 = vector.load %arg5[%c0_5, %c0_6] : memref<128x128xbf16, #tpu.memory_space<vmem>>, vector<128x128xbf16>
    %cst_7 = arith.constant dense<0.000000e+00> : vector<32x128xf32>
    %9 = tpu.matmul %7, %8, %cst_7 {dimension_numbers = #tpu.dot_dimension_numbers<[1], [0], [0], [1], [0, 0, 1, 1], [], []>} : vector<32x128xbf16>, vector<128x128xbf16>, vector<32x128xf32> -> vector<32x128xf32>
    %c0_8 = arith.constant 0 : index
    %c0_9 = arith.constant 0 : index
    %10 = vector.load %arg6[%c0_8, %c0_9] : memref<1x128xf32, #tpu.memory_space<vmem>>, vector<1x128xf32>
    %11 = vector.broadcast %10 : vector<1x128xf32> to vector<32x128xf32>
    %12 = arith.addf %9, %11 : vector<32x128xf32>
    %13 = math.tanh %12 : vector<32x128xf32>
    %14 = arith.truncf %13 : vector<32x128xf32> to vector<32x128xbf16>
    %c0_10 = arith.constant 0 : index
    %c0_11 = arith.constant 0 : index
    %15 = vector.load %arg7[%c0_10, %c0_11] : memref<128x32xbf16, #tpu.memory_space<vmem>>, vector<128x32xbf16>
    %cst_12 = arith.constant dense<0.000000e+00> : vector<32x32xf32>
    %16 = tpu.matmul %14, %15, %cst_12 {dimension_numbers = #tpu.dot_dimension_numbers<[1], [0], [0], [1], [0, 0, 1, 1], [], []>} : vector<32x128xbf16>, vector<128x32xbf16>, vector<32x32xf32> -> vector<32x32xf32>
    %c0_13 = arith.constant 0 : index
    %c0_14 = arith.constant 0 : index
    %17 = vector.load %arg8[%c0_13, %c0_14] : memref<1x32xf32, #tpu.memory_space<vmem>>, vector<1x32xf32>
    %18 = vector.broadcast %17 : vector<1x32xf32> to vector<32x32xf32>
    %19 = arith.addf %16, %18 : vector<32x32xf32>
    %c0_15 = arith.constant 0 : index
    %c0_16 = arith.constant 0 : index
    %20 = vector.load %arg2[%c0_15, %c0_16] : memref<32x32xi8, #tpu.memory_space<vmem>>, vector<32x32xi8>
    %c0_i8 = arith.constant 0 : i8
    %21 = vector.broadcast %c0_i8 : i8 to vector<32x32xi8>
    %22 = arith.cmpi ne, %20, %21 : vector<32x32xi8>
    %cst_17 = arith.constant -3.40282347E+38 : f32
    %23 = vector.broadcast %cst_17 : f32 to vector<32x32xf32>
    %24 = arith.select %22, %19, %23 : vector<32x32xi1>, vector<32x32xf32>
    %c0_18 = arith.constant 0 : index
    %c0_19 = arith.constant 0 : index
    %25 = vector.load %arg9[%c0_18, %c0_19] : memref<32x32xf32, #tpu.memory_space<vmem>>, vector<32x32xf32>
    tpu.vector_store %arg9[%c0_18, %c0_19], %24 {strides = array<i32>} : memref<32x32xf32, #tpu.memory_space<vmem>>, vector<32x32xf32>,
    return
  }
  func.func @transform_0(%arg0: i32) -> (i32, i32) {
    %c0_i32 = arith.constant 0 : i32
    %c0_i32_0 = arith.constant 0 : i32
    return %arg0, %c0_i32 : i32, i32
  }
  func.func @transform_1(%arg0: i32) -> (i32, i32) {
    %c0_i32 = arith.constant 0 : i32
    %c0_i32_0 = arith.constant 0 : i32
    return %arg0, %c0_i32 : i32, i32
  }
  func.func @transform_2(%arg0: i32) -> (i32, i32) {
    %c0_i32 = arith.constant 0 : i32
    %c0_i32_0 = arith.constant 0 : i32
    %c0_i32_1 = arith.constant 0 : i32
    return %c0_i32, %c0_i32_0 : i32, i32
  }
  func.func @transform_3(%arg0: i32) -> (i32, i32) {
    %c0_i32 = arith.constant 0 : i32
    %c0_i32_0 = arith.constant 0 : i32
    %c0_i32_1 = arith.constant 0 : i32
    return %c0_i32, %c0_i32_0 : i32, i32
  }
  func.func @transform_4(%arg0: i32) -> (i32, i32) {
    %c0_i32 = arith.constant 0 : i32
    %c0_i32_0 = arith.constant 0 : i32
    %c0_i32_1 = arith.constant 0 : i32
    return %c0_i32, %c0_i32_0 : i32, i32
  }
  func.func @transform_5(%arg0: i32) -> (i32, i32) {
    %c0_i32 = arith.constant 0 : i32
    %c0_i32_0 = arith.constant 0 : i32
    %c0_i32_1 = arith.constant 0 : i32
    return %c0_i32, %c0_i32_0 : i32, i32
  }
  func.func @transform_6(%arg0: i32) -> (i32, i32) {
    %c0_i32 = arith.constant 0 : i32
    %c0_i32_0 = arith.constant 0 : i32
    %c0_i32_1 = arith.constant 0 : i32
    return %c0_i32, %c0_i32_0 : i32, i32
  }
  func.func @transform_7(%arg0: i32) -> (i32, i32) {
    %c0_i32 = arith.constant 0 : i32
    %c0_i32_0 = arith.constant 0 : i32
    %c0_i32_1 = arith.constant 0 : i32
    return %c0_i32, %c0_i32_0 : i32, i32
  }
  func.func @transform_8(%arg0: i32) -> (i32, i32) {
    %c0_i32 = arith.constant 0 : i32
    %c0_i32_0 = arith.constant 0 : i32
    return %arg0, %c0_i32 : i32, i32
  }
}

</mosaic_0001>

<bundles_post_ra>
// kernel: tpu_custom_call.1
= control target key start
LH: loop header
LB: loop body
LE: loop exit
PB: predicated region body
PF: predicated region fallthrough
CT: control target
= control target key end

     0   :  { %13 = vsyncpa [#allocation3], 0  ;;  %s1330_s0 = inlined_call_operand.vmem [shape: bf16[64,128], index: 0, kind: input, shape index: {}]   ;;  %s1331_s1 = inlined_call_operand.vmem [shape: s8[64,32], index: 1, kind: input, shape index: {}]   ;;  %s1332_s2 = inlined_call_operand.vmem [shape: bf16[128,128], index: 2, kind: input, shape index: {}]   ;;  %s1333_s3 = inlined_call_operand.vmem [shape: f32[1,128], index: 3, kind: input, shape index: {}]   ;;  %s1334_s4 = inlined_call_operand.hbm [shape: bf16[128,128], index: 4, kind: input, shape index: {}]   ;;  %s1335_s5 = inlined_call_operand.hbm [shape: f32[1,128], index: 5, kind: input, shape index: {}]   ;;  %s1336_s6 = inlined_call_operand.vmem [shape: bf16[128,32], index: 6, kind: input, shape index: {}]   ;;  %s1337_s7 = inlined_call_operand.vmem [shape: f32[1,32], index: 7, kind: input, shape index: {}]   ;;  %s1338_s8 = inlined_call_operand.vmem [shape: f32[64,32], index: 8, kind: output, shape index: {}]  }
   0x1   :  { %14 = vsyncpa [#allocation5], 0  ;;  %s1202_s27 = smov 0  }
   0x2 LB: > { %s1208_s28 = sadd.s32 4294967295, %s1150_s27   ;;  %p877_p0 = scmp.ge.s32.totalorder %s1150_s27, 1  ;;  %s1150_s27 = sphi %s1202_s27, %s20_s27  }
   0x3   : > { %p229_p1 = scmp.lt.s32.totalorder %s1150_s27, 3  ;;  %s1152_s29 = smov [#allocation2]  }
   0x4   : > { %s247_s30 = sshll.u32 %s1152_s29, 4  ;;  %p1025_p3 = scmp.eq.s32.totalorder %s1208_s28, 0  ;;  %s248_s30 = int_to_ptr.vmem [resolvable:$true] %s247_s30 }
   0x5   : > { %p1212_p2 = pnand %p877_p0, %p229_p1  ;;  %s1153_s10 = smov [#allocation4]  }
   0x6   : > { %s261_s11 = sshll.u32 %s1153_s10, 4  ;;  %s1095_s13 = scalar_lea.vmem %s248_s30, 1024  ;;  %s262_s11 = int_to_ptr.vmem [resolvable:$true] %s261_s11 }
   0x7   : > { %p1018_p4 = pneg %p1212_p2  ;;  %p1096_p7 = scmp.ne.s32.totalorder %s248_s30, %s1095_s13 }
   0x8   : > { %p1103_p10 = scmp.lt.s32.totalorder %s248_s30, %s248_s30  ;;  %p1104_p11 = scmp.lt.s32.totalorder %s1095_s13, %s1095_s13 }
   0x9   : > { %p1221_p5 = pnand %p1025_p3, %p1018_p4 }
   0xa   : > { %p1105_p12 = por %p1104_p11, %p1103_p10 }
   0xb   : > { %p1086_p6 = pneg %p1221_p5 }
   0xd   : > { %p1098_p8 = pnand %p1096_p7, %p1086_p6 }
   0xf   : > { %p1099_p9 = pneg %p1098_p8 }
  0x11   : > { %p1106_p13 = pnand %p1105_p12, %p1099_p9 }
  0x13   : > { %1109 = shalt.err (!%p1106_p13)
}
  0x14   : > { %s1154_s14 = smov 64   ;;  %s1155_s15 = smov 4  }
  0x15   : > { %1021 = dma.hbm_to_vmem [thread:$0]  (!%p1221_p5), %s1334_s4, 1024, %s248_s30, [#allocation3], %s1154_s14, %s1154_s14, %s1155_s15  }
  0x16   : > { %s1121_s18 = scalar_lea.vmem %s262_s11, 16  ;;  %s1128_s19 = scalar_lea.vmem %s262_s11, 32 }
  0x17   : > { %p1122_p0 = scmp.ne.s32.totalorder %s262_s11, %s1121_s18  ;;  %p1129_p7 = scmp.lt.s32.totalorder %s262_s11, %s262_s11 }
  0x18   : > { %p1130_p8 = scmp.lt.s32.totalorder %s1128_s19, %s1121_s18 }
  0x19   : > { %p1124_p1 = pnand %p1122_p0, %p1086_p6 }
  0x1a   : > { %p1131_p9 = por %p1130_p8, %p1129_p7 }
  0x1b   : > { %p1125_p4 = pneg %p1124_p1 }
  0x1d   : > { %p1132_p10 = pnand %p1131_p9, %p1125_p4 }
  0x1f   : > { %1135 = shalt.err (!%p1132_p10)
}
  0x20   : > { %1024 = dma.hbm_to_vmem [thread:$0]  (!%p1221_p5), %s1335_s5, 16, %s262_s11, [#allocation5]  }
  0x21   : > { %296 = sbr.rel (%p1212_p2) target bundleno = 713 (0x2c9), region = 52 }
  0x26   : > { %1141 = dma.done.wait (%p1025_p3), [#allocation3], 1024  }
  0x27   : > { %1143 = vsyncadd (%p1025_p3), [#allocation3], 4294966272 }
  0x28   : > { %1145 = dma.done.wait (%p1025_p3), [#allocation5], 16  }
  0x29   : > { %1147 = vsyncadd (%p1025_p3), [#allocation5], 4294967280  ;;  %s884_s22 = sshll.u32 %s1208_s28, 2  ;;  %v1042_v0 = vld [vmem:[%s1332_s2 + $0x38] sm:$0xff]   ;;  %v1043_v1 = vld [vmem:[%s1332_s2 + $0x30] sm:$0xff]   ;;  %p344_p2 = scmp.lt.s32.totalorder %s1208_s28, 1 }
  0x2a   : > { %p339_p6 = scmp.lt.s32.totalorder %s884_s22, 7  ;;  %950 = vmatprep.subr.bf16.mxu0 %v1042_v0  ;;  %v1044_v2 = vld [vmem:[%s1332_s2 + $0x28] sm:$0xff]   ;;  %v1045_v3 = vld [vmem:[%s1332_s2 + $0x20] sm:$0xff]   ;;  %v1046_v5 = vld [vmem:[%s1332_s2 + $0x18] sm:$0xff]   ;;  %v1156_v57 = vmov 0   ;;  %vm780_vm6 = vcmask 261120  }
  0x2b   : > { %951 = vmatpush3.bf16.msra.mxu0 %v1042_v0  ;;  %v1052_v6 = vld [vmem:[#allocation2 + $0x38] sm:$0xff]   ;;  %v1053_v7 = vld [vmem:[#allocation2 + $0x30] sm:$0xff]   ;;  %v1048_v9 = vld [vmem:[%s1332_s2 + $0x8] sm:$0xff]   ;;  %s1344_s28 = smov (!%p344_p2, %s1208_s28), 1 }
  0x2c   : > { %s1342_s22 = smov (!%p339_p6, %s884_s22), 7  ;;  %952 = vmatprep.subr.bf16.mxu0 %v1043_v1  ;;  %970 = vmatprep.subr.bf16.mxu1 %v1052_v6  ;;  %v1047_v8 = vld [vmem:[%s1332_s2 + $0x10] sm:$0xff]   ;;  %v1049_v10 = vld [vmem:[%s1332_s2] sm:$0xff]   ;;  %v1054_v12 = vld [vmem:[#allocation2 + $0x28] sm:$0xff]   ;;  %s886_s23 = sshll.u32 %s1344_s28, 3 }
  0x2d   : > { %s885_s29 = sshll.u32 %s1342_s22, 2  ;;  %971 = vmatpush3.bf16.msra.mxu1 %v1052_v6  ;;  %v1055_v13 = vld [vmem:[#allocation2 + $0x20] sm:$0xff]   ;;  %v1056_v14 = vld [vmem:[#allocation2 + $0x18] sm:$0xff]   ;;  %v1057_v15 = vld [vmem:[#allocation2 + $0x10] sm:$0xff]   ;;  %s347_s26 = scalar_lea.vmem %s1331_s1, %s886_s23 }
  0x2e   : > { %s342_s12 = scalar_lea.vmem %s1330_s0, %s885_s29  ;;  %972 = vmatprep.subr.bf16.mxu1 %v1053_v7  ;;  %v1058_v16 = vld [vmem:[#allocation2 + $0x8] sm:$0xff]   ;;  %v1059_v17 = vld [vmem:[#allocation2] sm:$0xff]   ;;  %v1060_v18 = vld [vmem:[%s1336_s6 + $0x38] sm:$0xff]   ;;  %s888_s28 = sshll.u32 %s1342_s22, 3 }
  0x2f   : > { %953 = vmatpush3.bf16.msra.mxu0 %v1043_v1  ;;  %v1050_v4 = vld [vmem:[%s342_s12] sm:$0xff]   ;;  %v1051_v11 = vld [vmem:[%s342_s12 + $0x8] sm:$0xff]   ;;  %v1061_v19 = vld [vmem:[%s1336_s6 + $0x30] sm:$0xff]   ;;  %s352_s11 = scalar_lea.vmem %s1338_s8, %s888_s28 }
  0x30   : > { %954 = vmatprep.subr.bf16.mxu0 %v1044_v2  ;;  %966 = vmatprep.mubr.bf16.mxu0 %v1050_v4  ;;  %v889_v21 = vld [vmem:[%s1333_s3] ss:$0 sm:$0xff]  ;;  %v1062_v35 = vld [vmem:[%s1336_s6 + $0x28] sm:$0xff]   ;;  %v1064_v37 = vld [vmem:[%s1336_s6 + $0x18] sm:$0xff]  }
  0x31   : > { %973 = vmatpush3.bf16.msra.mxu1 %v1053_v7  ;;  %v1063_v36 = vld [vmem:[%s1336_s6 + $0x20] sm:$0xff]   ;;  %v1065_v38 = vld [vmem:[%s1336_s6 + $0x10] sm:$0xff]   ;;  %v1066_v39 = vld [vmem:[%s1336_s6 + $0x8] sm:$0xff]  }
  0x32   : > { %974 = vmatprep.subr.bf16.mxu1 %v1054_v12  ;;  %v1067_v40 = vld [vmem:[%s1336_s6] sm:$0xff]  }
  0x33   : > { %955 = vmatpush3.bf16.msra.mxu0 %v1044_v2  ;;  %v900_v42 = vld [vmem:[#allocation4] ss:$0 sm:$0xff] }
  0x34   : > { %956 = vmatprep.subr.bf16.mxu0 %v1045_v3  ;;  %v745_v56 = vld [vmem:[%s347_s26] sm:$0xff] }
  0x35   : > { %975 = vmatpush3.bf16.msra.mxu1 %v1054_v12  ;;  %vm746_vm0 = vnez %v745_v56 }
  0x36   : > { %976 = vmatprep.subr.bf16.mxu1 %v1055_v13  ;;  %v747_v58 = vsel %vm746_vm0, 16843009, %v1156_v57 }
  0x37   : > { %957 = vmatpush3.bf16.msra.mxu0 %v1045_v3  ;;  %v748_v59 = vunpack.c.0.s8 %v747_v58  ;;  %v749_v61 = vunpack.c.1.s8 %v747_v58  ;;  %v750_v62 = vunpack.c.2.s8 %v747_v58  ;;  %v751_v63 = vunpack.c.3.s8 %v747_v58 }
  0x38   : > { %958 = vmatprep.subr.bf16.mxu0 %v1046_v5 }
  0x39   : > { %977 = vmatpush3.bf16.msra.mxu1 %v1055_v13  ;;  %v752_v60 = vpack.c.b16 %v748_v59, %v748_v59  ;;  %v754_v1 = vpack.c.b16 %v749_v61, %v749_v61  ;;  %v756_v2 = vpack.c.b16 %v750_v62, %v750_v62  ;;  %v758_v3 = vpack.c.b16 %v751_v63, %v751_v63  ;;  %v909_v13 = vld [vmem:[%s1337_s7] ss:$0 sm:$0xff] }
  0x3a   : > { %978 = vmatprep.subr.bf16.mxu1 %v1056_v14 }
  0x3b   : > { %959 = vmatpush3.bf16.msra.mxu0 %v1046_v5  ;;  %v753_v0 = vpack.c.b8 %v752_v60, %v752_v60  ;;  %v755_v4 = vpack.c.b8 %v754_v1, %v754_v1  ;;  %v757_v5 = vpack.c.b8 %v756_v2, %v756_v2  ;;  %v759_v6 = vpack.c.b8 %v758_v3, %v758_v3 }
  0x3c   : > { %960 = vmatprep.subr.bf16.mxu0 %v1047_v8 }
  0x3d   : > { %979 = vmatpush3.bf16.msra.mxu1 %v1056_v14  ;;  %vm760_vm1 = vnez %v753_v0  ;;  %vm761_vm2 = vnez %v755_v4  ;;  %vm762_vm3 = vnez %v757_v5  ;;  %vm763_vm4 = vnez %v759_v6 }
  0x3e   : > { %980 = vmatprep.subr.bf16.mxu1 %v1057_v15  ;;  %v764_v7 = vsel %vm760_vm1, 16843009, %v1156_v57  ;;  %v767_v12 = vsel %vm763_vm4, 16843009, %v1156_v57 }
  0x3f   : > { %961 = vmatpush3.bf16.msra.mxu0 %v1047_v8  ;;  %v768_v8 = vunpack.c.0.s8 %v764_v7 }
  0x40   : > { %962 = vmatprep.subr.bf16.mxu0 %v1048_v9 }
  0x41   : > { %981 = vmatpush3.bf16.msra.mxu1 %v1057_v15  ;;  %vm772_vm5 = vcmp.ne.s32.totalorder %v768_v8, 0 }
  0x42   : > { %982 = vmatprep.subr.bf16.mxu1 %v1058_v16 }
  0x43   : > { %963 = vmatpush3.bf16.msra.mxu0 %v1048_v9  ;;  %v765_v9 = vsel %vm761_vm2, 16843009, %v1156_v57 }
  0x44   : > { %964 = vmatprep.subr.bf16.mxu0 %v1049_v10  ;;  %v769_v15 = vunpack.c.0.s8 %v765_v9 }
  0x45   : > { %983 = vmatpush3.bf16.msra.mxu1 %v1058_v16 }
  0x46   : > { %984 = vmatprep.subr.bf16.mxu1 %v1059_v17  ;;  %vm773_vm7 = vcmp.ne.s32.totalorder %v769_v15, 0 }
  0x47   : > { %965 = vmatpush3.bf16.msra.mxu0 %v1049_v10 }
  0x48   : > { %990 = vmatprep.subr.bf16.mxu0 %v1060_v18 }
  0x49   : > { %985 = vmatpush3.bf16.msra.mxu1 %v1059_v17 }
  0x4a   : > { %967 = vmatmul.mubr.bf16.vlgmr.msra.gmra.mxu0 %v1051_v11  ;;  %v766_v11 = vsel %vm762_vm3, 16843009, %v1156_v57 }
  0x4b   : > { %991 = vmatpush3.bf16.msra.mxu0 %v1060_v18  ;;  %v770_v16 = vunpack.c.0.s8 %v766_v11 }
  0x4c   : > { %992 = vmatprep.subr.bf16.mxu0 %v1061_v19 }
  0x4d   : > { %vm774_vm8 = vcmp.ne.s32.totalorder %v770_v16, 0 }
  0x4f   : > { %993 = vmatpush3.bf16.msra.mxu0 %v1061_v19  ;;  %v771_v19 = vunpack.c.0.s8 %v767_v12 }
  0x50   : > { %994 = vmatprep.subr.bf16.mxu0 %v1062_v35 }
  0x51   : > { %vm775_vm9 = vcmp.ne.s32.totalorder %v771_v19, 0 }
  0x53   : > { %995 = vmatpush3.bf16.msra.mxu0 %v1062_v35 }
  0x54   : > { %996 = vmatprep.subr.bf16.mxu0 %v1063_v36 }
  0x57   : > { %997 = vmatpush3.bf16.msra.mxu0 %v1063_v36 }
  0x58   : > { %998 = vmatprep.subr.bf16.mxu0 %v1064_v37 }
  0x5b   : > { %999 = vmatpush3.bf16.msra.mxu0 %v1064_v37 }
  0x5c   : > { %1000 = vmatprep.subr.bf16.mxu0 %v1065_v38 }
  0x5f   : > { %1001 = vmatpush3.bf16.msra.mxu0 %v1065_v38 }
  0x60   : > { %1002 = vmatprep.subr.bf16.mxu0 %v1066_v39 }
  0x63   : > { %1003 = vmatpush3.bf16.msra.mxu0 %v1066_v39 }
  0x64   : > { %1004 = vmatprep.subr.bf16.mxu0 %v1067_v40 }
  0x67   : > { %1005 = vmatpush3.bf16.msra.mxu0 %v1067_v40 }
 0x10a   : > { %v968_v20 = vpop.f32.mrf.mxu0 }
 0x10b   : > { %v487_v26 = vadd.f32 %v968_v20, %v889_v21 }
 0x10c   : > { %v478_v22 = vpop.f32.mrf.mxu0 }
 0x10d   : > { %v479_v23 = vadd.f32 %v889_v21, %v478_v22 }
 0x10e   : > { %v969_v24 = vpop.f32.mrf.mxu0 }
 0x10f   : > { %v490_v25 = vadd.f32 %v969_v24, %v889_v21  ;;  %1068 = vtanh.f32 %v479_v23 }
 0x110   : > { %v481_v27 = vpop.f32.mrf.mxu0 }
 0x111   : > { %v482_v28 = vadd.f32 %v889_v21, %v481_v27  ;;  %1070 = vtanh.f32 %v490_v25 }
 0x113   : > { %1072 = vtanh.f32 %v482_v28 }
 0x114   : > { %1074 = vtanh.f32 %v487_v26 }
 0x11c   : > { %v1069_v29 = vpop.eup %1068 }
 0x11e   : > { %v1071_v30 = vpop.eup %1070 }
 0x120   : > { %v1073_v31 = vpop.eup %1072 }
 0x121   : > { %v1075_v32 = vpop.eup %1074  ;;  %v497_v33 = vpack.c.bf16 %v1073_v31, %v1069_v29 }
 0x122   : > { %v498_v34 = vpack.c.bf16 %v1071_v30, %v1075_v32 }
 0x123   : > { %986 = vmatprep.mubr.bf16.mxu1 %v497_v33 }
 0x124   : > { %987 = vmatmul.mubr.bf16.vlgmr.msra.gmra.mxu1 %v498_v34 }
 0x1e4   : > { %v988_v41 = vpop.f32.mrf.mxu1 }
 0x1e5   : > { %v613_v47 = vadd.f32 %v988_v41, %v900_v42 }
 0x1e6   : > { %v604_v43 = vpop.f32.mrf.mxu1 }
 0x1e7   : > { %v605_v44 = vadd.f32 %v900_v42, %v604_v43 }
 0x1e8   : > { %v989_v45 = vpop.f32.mrf.mxu1 }
 0x1e9   : > { %v616_v46 = vadd.f32 %v989_v45, %v900_v42  ;;  %1076 = vtanh.f32 %v605_v44 }
 0x1ea   : > { %v607_v48 = vpop.f32.mrf.mxu1 }
 0x1eb   : > { %v608_v49 = vadd.f32 %v900_v42, %v607_v48  ;;  %1078 = vtanh.f32 %v616_v46 }
 0x1ed   : > { %1080 = vtanh.f32 %v608_v49 }
 0x1ee   : > { %1082 = vtanh.f32 %v613_v47 }
 0x1f6   : > { %v1077_v50 = vpop.eup %1076 }
 0x1f8   : > { %v1079_v51 = vpop.eup %1078 }
 0x1fa   : > { %v1081_v52 = vpop.eup %1080 }
 0x1fb   : > { %v1083_v53 = vpop.eup %1082  ;;  %v623_v54 = vpack.c.bf16 %v1081_v52, %v1077_v50 }
 0x1fc   : > { %v624_v55 = vpack.c.bf16 %v1079_v51, %v1083_v53 }
 0x1fd   : > { %1006 = vmatprep.mubr.bf16.mxu0 %v623_v54 }
 0x1fe   : > { %1007 = vmatmul.mubr.bf16.vlgmr.msra.gmra.mxu0 %v624_v55 }
 0x2be   : > { %v1008_v10 = vpop.f32.mrf.mxu0 }
 0x2bf   : > { %v739_v21 = vadd.f32 %v1008_v10, %v909_v13 }
 0x2c0   : > { %v730_v14 = vpop.f32.mrf.mxu0 }
 0x2c1   : > { %v731_v17 = vadd.f32 %v909_v13, %v730_v14  ;;  %v778_v26 = vsel %vm774_vm8, %v739_v21, -3.4028235e+38 }
 0x2c2   : > { %v1009_v18 = vpop.f32.mrf.mxu0  ;;  %783 = vst.msk [vmem:[%s352_s11 + $0x10] sm:$0xff] %vm780_vm6, %v778_v26 }
 0x2c3   : > { %v776_v20 = vsel %vm772_vm5, %v731_v17, -3.4028235e+38  ;;  %v742_v23 = vadd.f32 %v1009_v18, %v909_v13 }
 0x2c4   : > { %781 = vst.msk [vmem:[%s352_s11] sm:$0xff] %vm780_vm6, %v776_v20  ;;  %v733_v22 = vpop.f32.mrf.mxu0 }
 0x2c5   : > { %v734_v24 = vadd.f32 %v909_v13, %v733_v22  ;;  %v779_v27 = vsel %vm775_vm9, %v742_v23, -3.4028235e+38 }
 0x2c6   : > { %784 = vst.msk [vmem:[%s352_s11 + $0x18] sm:$0xff] %vm780_vm6, %v779_v27 }
 0x2c7   : > { %v777_v25 = vsel %vm773_vm7, %v734_v24, -3.4028235e+38 }
 0x2c8   : > { %782 = vst.msk [vmem:[%s352_s11 + $0x8] sm:$0xff] %vm780_vm6, %v777_v25 }
 0x2c9 PF: > { %s20_s27 = sadd.s32 1, %s1150_s27  }
 0x2ca   : > { %p17_p3 = scmp.ge.s32.totalorder %s20_s27, 4  }
 0x2cc   :  { %19 = sbr.rel (!%p17_p3) target bundleno = 2 (0x2), region = 94 }
 0x2d1   :  { %807 = vsyncpa [#allocation3], 1 }
 0x2d2   :  { %809 = vsyncpa [#allocation3 + $0x1], 1 }
 0x2d3   :  { %810 = vsyncpa [#allocation5], 1 }

</bundles_post_ra>
